<compile_context>
chip_gen: v5e
topology: v5e:2x2
jax: 0.10.0
libtpu: 0.0.40
codegen_flags: <defaults>
</compile_context>

<pallas_src>
import functools

import numpy as np
import jax
import jax.numpy as jnp
from jax.experimental import pallas as pl
from jax.experimental.pallas import tpu as pltpu


_STATIC_UNROLL_MAX_C = 32                  # above this, use fori_loop in the copy kernel
_DEFAULT_VMEM_BUDGET = 8 * 1024 * 1024     # in+out, double-buffered pipelined footprint


def _round_up(a, b):
    return -(-a // b) * b


# ---------------------------------------------------------------------------
# In-kernel channel (sublane-row) permutation
# ---------------------------------------------------------------------------

def _permute_rows_take(x, groups, cpg):
    """out[c] = x[(c % groups) * cpg + c // groups] via a 1-D-index gather."""
    C = x.shape[0]
    perm = np.array([(c % groups) * cpg + c // groups for c in range(C)], np.int32)
    return jnp.take(x, jnp.asarray(perm), axis=0)


def _permute_rows_take_along_axis(x, groups, cpg):
    """Same permutation spelled as a full-shape take_along_axis gather."""
    C = x.shape[0]
    row = jax.lax.broadcasted_iota(jnp.int32, (C, 1), 0)
    src = (row % groups) * cpg + row // groups          # tiny (C, 1) index compute
    src = jnp.broadcast_to(src, x.shape)                # cheap lane broadcast
    return jnp.take_along_axis(x, src, axis=0)


def _make_gather_kernel(groups, cpg, permute_fn):
    """Block (1, C, T): one gather (XLU slot) + one unmasked full-block store."""
    def kernel(x_ref, o_ref):
        o_ref[0] = permute_fn(x_ref[0], groups, cpg)
    return kernel


def _copy_kernel(x_ref, o_ref, *, groups, cpg):
    """Fallback: per-output-channel copies.  Works for blocks of any rank
    (1, C, ...).  Static unroll for small C, fori_loop otherwise so the
    program size / scheduling window stays bounded for ShuffleNet-scale C."""
    C = groups * cpg

    def copy_one(dst):
        src = (dst % groups) * cpg + dst // groups
        o_ref[0, pl.ds(dst, 1)] = x_ref[0, pl.ds(src, 1)]

    if C <= _STATIC_UNROLL_MAX_C:
        for dst in range(C):
            copy_one(dst)
    else:
        def body(dst, carry):
            copy_one(dst)
            return carry
        jax.lax.fori_loop(0, C, body, 0)


@functools.lru_cache(maxsize=None)
def _pick_row_permuter(groups, cpg):
    """Probe (once per (groups, cpg)) whether a sublane gather lowers on this
    Mosaic version and matches the exact permutation; return it or None."""
    C = groups * cpg
    x = jnp.arange(C * 128, dtype=jnp.float32).reshape(1, C, 128)
    want = x.reshape(1, groups, cpg, 128).swapaxes(1, 2).reshape(1, C, 128)
    for fn in (_permute_rows_take, _permute_rows_take_along_axis):
        try:
            y = pl.pallas_call(
                _make_gather_kernel(groups, cpg, fn),
                out_shape=jax.ShapeDtypeStruct((1, C, 128), jnp.float32),
            )(x)
            if bool(jnp.all(jax.block_until_ready(y) == want)):
                return fn
        except Exception:
            continue
    return None


# ---------------------------------------------------------------------------
# Tile sizing from a VMEM budget
# ---------------------------------------------------------------------------

def _pick_lane_tile(S, C, itemsize, budget, prefer_split):
    """Largest 128-multiple divisor of S whose double-buffered in+out footprint
    (4 * C * tile * itemsize) fits the budget.  When prefer_split, prefer >= 2
    grid steps so pipelining / megacore sharding stay active for N == 1."""
    cands = [t for t in range(128, S + 1, 128) if S % t == 0]
    fit = [t for t in cands if 4 * C * t * itemsize <= budget] or [cands[0]]
    if prefer_split:
        split = [t for t in fit if S // t >= 2]
        if split:
            return max(split)
    return max(fit)


def _pick_h_tile(H, W_lanes, C, itemsize, budget, prefer_split):
    """Tile height for the 4-D fallback: a multiple-of-8 divisor of H (or H
    itself), sized from the lane/sublane-padded VMEM footprint."""
    cands = sorted({d for d in range(8, H + 1, 8) if H % d == 0} | {H})

    def footprint(th):
        return 4 * C * _round_up(th, 8) * _round_up(W_lanes, 128) * itemsize

    fit = [t for t in cands if footprint(t) <= budget] or [cands[0]]
    if prefer_split:
        split = [t for t in fit if H // t >= 2]
        if split:
            return max(split)
    return max(fit)


# ---------------------------------------------------------------------------
# Wrapper
# ---------------------------------------------------------------------------

def channel_shuffle(x, groups, *, vmem_budget_bytes=_DEFAULT_VMEM_BUDGET):
    """Pallas-TPU ChannelShuffle on an NCHW tensor (any dtype)."""
    N, C, H, W = x.shape
    assert C % groups == 0, (C, groups)
    cpg = C // groups
    if groups == 1 or cpg == 1:
        return x                                    # identity permutation

    orig_dtype = x.dtype
    itemsize = jnp.dtype(orig_dtype).itemsize
    HW = H * W
    pack = {1: 4, 2: 2}.get(itemsize, 1)            # spatial elements per u32 word

    cost = pl.CostEstimate(flops=0, transcendentals=0,
                           bytes_accessed=2 * N * C * HW * itemsize)
    sem = ("parallel", "parallel")

    if HW % pack == 0 and (HW // pack) % 128 == 0:
        # ---- Main path: flatten spatial, lane-dense 32-bit tiles ----------
        S = HW // pack
        xk = x.reshape(N, C, HW)
        if pack > 1:
            xk = jax.lax.bitcast_convert_type(xk.reshape(N, C, S, pack), jnp.uint32)
        kitem = jnp.dtype(xk.dtype).itemsize
        tile = _pick_lane_tile(S, C, kitem, vmem_budget_bytes, prefer_split=(N == 1))
        grid = (N, S // tile)
        block = pl.BlockSpec((1, C, tile), lambda n, s: (n, 0, s))
        pipelined = 4 * C * tile * kitem

        permute_fn = _pick_row_permuter(groups, cpg)
        if permute_fn is not None:
            kernel = _make_gather_kernel(groups, cpg, permute_fn)
        else:
            kernel = functools.partial(_copy_kernel, groups=groups, cpg=cpg)

        y = pl.pallas_call(
            kernel,
            out_shape=jax.ShapeDtypeStruct(xk.shape, xk.dtype),
            grid=grid,
            in_specs=[block],
            out_specs=block,
            compiler_params=pltpu.CompilerParams(
                dimension_semantics=sem,
                vmem_limit_bytes=int(min(32 << 20, max(16 << 20, 2 * pipelined)))),
            cost_estimate=cost,
        )(xk)

        if pack > 1:
            y = jax.lax.bitcast_convert_type(y, orig_dtype).reshape(N, C, HW)
        return y.reshape(N, C, H, W)

    # ---- Fallback: H*W not 128-divisible -> stay 4-D, tile along H --------
    if pack > 1 and W % pack == 0:
        We = W // pack
        xk = jax.lax.bitcast_convert_type(x.reshape(N, C, H, We, pack), jnp.uint32)
    else:
        pack = 1
        We = W
        xk = x
    kitem = jnp.dtype(xk.dtype).itemsize
    th = _pick_h_tile(H, We, C, kitem, vmem_budget_bytes, prefer_split=(N == 1))
    grid = (N, H // th)
    block = pl.BlockSpec((1, C, th, We), lambda n, h: (n, 0, h, 0))
    pipelined = 4 * C * _round_up(th, 8) * _round_up(We, 128) * kitem

    y = pl.pallas_call(
        functools.partial(_copy_kernel, groups=groups, cpg=cpg),
        out_shape=jax.ShapeDtypeStruct(xk.shape, xk.dtype),
        grid=grid,
        in_specs=[block],
        out_specs=block,
        compiler_params=pltpu.CompilerParams(
            dimension_semantics=sem,
            vmem_limit_bytes=int(min(32 << 20, max(16 << 20, 2 * pipelined)))),
        cost_estimate=cost,
    )(xk)

    if pack > 1:
        y = jax.lax.bitcast_convert_type(y, orig_dtype).reshape(N, C, H, W)
    return y.reshape(N, C, H, W)


def channel_shuffle_ref(x, groups):
    """Pure-JAX reference matching the PyTorch module exactly."""
    N, C, H, W = x.shape
    cpg = C // groups
    y = x.reshape(N, groups, cpg, H, W)
    y = jnp.swapaxes(y, 1, 2)
    return y.reshape(N, C, H, W)


if __name__ == "__main__":
    key = jax.random.PRNGKey(0)
    k1, k2, k3 = jax.random.split(key, 3)

    # 1) f32, lane-dense path (HW = 256), ShuffleNet-style groups=3.
    x1 = jax.random.normal(k1, (2, 12, 16, 16), jnp.float32)
    y1 = jax.block_until_ready(jax.jit(functools.partial(channel_shuffle, groups=3))(x1))
    assert y1.shape == x1.shape and y1.dtype == x1.dtype
    assert bool(jnp.all(y1 == channel_shuffle_ref(x1, 3))), "f32 mismatch"

    # 2) bf16, exercises the u32 lane-packing and the N==1 grid split.
    x2 = jax.random.normal(k2, (1, 8, 16, 32), jnp.float32).astype(jnp.bfloat16)
    y2 = jax.block_until_ready(jax.jit(functools.partial(channel_shuffle, groups=4))(x2))
    assert y2.dtype == jnp.bfloat16
    assert bool(jnp.all(y2 == channel_shuffle_ref(x2, 4))), "bf16 mismatch"

    # 3) f32, H*W not 128-divisible -> 4-D fallback tiled along H (W full-extent).
    x3 = jax.random.normal(k3, (1, 6, 16, 20), jnp.float32)
    y3 = jax.block_until_ready(jax.jit(functools.partial(channel_shuffle, groups=3))(x3))
    assert bool(jnp.all(y3 == channel_shuffle_ref(x3, 3))), "fallback mismatch"

    print("KERNEL_OK")
</pallas_src>

<mosaic_0001>
module attributes {stable_mosaic.version = 11 : i64} {
  func.func @_copy_kernel(%arg0: i32, %arg1: i32, %arg2: memref<1x12x256xf32, #tpu.memory_space<vmem>>, %arg3: memref<1x12x256xf32, #tpu.memory_space<vmem>>) attributes {dimension_semantics = [#tpu.dimension_semantics<parallel>, #tpu.dimension_semantics<parallel>], iteration_bounds = array<i64: 2, 1>, scalar_prefetch = 0 : i64, scratch_operands = 0 : i64, tpu.core_type = #tpu.core_type<tc>, window_params = [{transform_indices = @transform_0, window_bounds = array<i64: 1, 12, 256>}, {transform_indices = @transform_1, window_bounds = array<i64: 1, 12, 256>}]} {
    %c0 = arith.constant 0 : index
    %c0_0 = arith.constant 0 : index
    %c0_1 = arith.constant 0 : index
    %0 = vector.load %arg2[%c0, %c0_0, %c0_1] : memref<1x12x256xf32, #tpu.memory_space<vmem>>, vector<1x1x256xf32>
    %1 = vector.shape_cast %0 : vector<1x1x256xf32> to vector<1x256xf32>
    %c0_2 = arith.constant 0 : index
    %c0_3 = arith.constant 0 : index
    %c0_4 = arith.constant 0 : index
    %2 = vector.load %arg3[%c0_2, %c0_3, %c0_4] : memref<1x12x256xf32, #tpu.memory_space<vmem>>, vector<1x1x256xf32>
    %3 = vector.shape_cast %2 : vector<1x1x256xf32> to vector<1x256xf32>
    %4 = vector.shape_cast %1 : vector<1x256xf32> to vector<1x1x256xf32>
    tpu.vector_store %arg3[%c0_2, %c0_3, %c0_4], %4 {strides = array<i32>} : memref<1x12x256xf32, #tpu.memory_space<vmem>>, vector<1x1x256xf32>,
    %c0_5 = arith.constant 0 : index
    %c4 = arith.constant 4 : index
    %c0_6 = arith.constant 0 : index
    %5 = vector.load %arg2[%c0_5, %c4, %c0_6] : memref<1x12x256xf32, #tpu.memory_space<vmem>>, vector<1x1x256xf32>
    %6 = vector.shape_cast %5 : vector<1x1x256xf32> to vector<1x256xf32>
    %c0_7 = arith.constant 0 : index
    %c1 = arith.constant 1 : index
    %c0_8 = arith.constant 0 : index
    %7 = vector.load %arg3[%c0_7, %c1, %c0_8] : memref<1x12x256xf32, #tpu.memory_space<vmem>>, vector<1x1x256xf32>
    %8 = vector.shape_cast %7 : vector<1x1x256xf32> to vector<1x256xf32>
    %9 = vector.shape_cast %6 : vector<1x256xf32> to vector<1x1x256xf32>
    tpu.vector_store %arg3[%c0_7, %c1, %c0_8], %9 {strides = array<i32>} : memref<1x12x256xf32, #tpu.memory_space<vmem>>, vector<1x1x256xf32>,
    %c0_9 = arith.constant 0 : index
    %c8 = arith.constant 8 : index
    %c0_10 = arith.constant 0 : index
    %10 = vector.load %arg2[%c0_9, %c8, %c0_10] : memref<1x12x256xf32, #tpu.memory_space<vmem>>, vector<1x1x256xf32>
    %11 = vector.shape_cast %10 : vector<1x1x256xf32> to vector<1x256xf32>
    %c0_11 = arith.constant 0 : index
    %c2 = arith.constant 2 : index
    %c0_12 = arith.constant 0 : index
    %12 = vector.load %arg3[%c0_11, %c2, %c0_12] : memref<1x12x256xf32, #tpu.memory_space<vmem>>, vector<1x1x256xf32>
    %13 = vector.shape_cast %12 : vector<1x1x256xf32> to vector<1x256xf32>
    %14 = vector.shape_cast %11 : vector<1x256xf32> to vector<1x1x256xf32>
    tpu.vector_store %arg3[%c0_11, %c2, %c0_12], %14 {strides = array<i32>} : memref<1x12x256xf32, #tpu.memory_space<vmem>>, vector<1x1x256xf32>,
    %c0_13 = arith.constant 0 : index
    %c1_14 = arith.constant 1 : index
    %c0_15 = arith.constant 0 : index
    %15 = vector.load %arg2[%c0_13, %c1_14, %c0_15] : memref<1x12x256xf32, #tpu.memory_space<vmem>>, vector<1x1x256xf32>
    %16 = vector.shape_cast %15 : vector<1x1x256xf32> to vector<1x256xf32>
    %c0_16 = arith.constant 0 : index
    %c3 = arith.constant 3 : index
    %c0_17 = arith.constant 0 : index
    %17 = vector.load %arg3[%c0_16, %c3, %c0_17] : memref<1x12x256xf32, #tpu.memory_space<vmem>>, vector<1x1x256xf32>
    %18 = vector.shape_cast %17 : vector<1x1x256xf32> to vector<1x256xf32>
    %19 = vector.shape_cast %16 : vector<1x256xf32> to vector<1x1x256xf32>
    tpu.vector_store %arg3[%c0_16, %c3, %c0_17], %19 {strides = array<i32>} : memref<1x12x256xf32, #tpu.memory_space<vmem>>, vector<1x1x256xf32>,
    %c0_18 = arith.constant 0 : index
    %c5 = arith.constant 5 : index
    %c0_19 = arith.constant 0 : index
    %20 = vector.load %arg2[%c0_18, %c5, %c0_19] : memref<1x12x256xf32, #tpu.memory_space<vmem>>, vector<1x1x256xf32>
    %21 = vector.shape_cast %20 : vector<1x1x256xf32> to vector<1x256xf32>
    %c0_20 = arith.constant 0 : index
    %c4_21 = arith.constant 4 : index
    %c0_22 = arith.constant 0 : index
    %22 = vector.load %arg3[%c0_20, %c4_21, %c0_22] : memref<1x12x256xf32, #tpu.memory_space<vmem>>, vector<1x1x256xf32>
    %23 = vector.shape_cast %22 : vector<1x1x256xf32> to vector<1x256xf32>
    %24 = vector.shape_cast %21 : vector<1x256xf32> to vector<1x1x256xf32>
    tpu.vector_store %arg3[%c0_20, %c4_21, %c0_22], %24 {strides = array<i32>} : memref<1x12x256xf32, #tpu.memory_space<vmem>>, vector<1x1x256xf32>,
    %c0_23 = arith.constant 0 : index
    %c9 = arith.constant 9 : index
    %c0_24 = arith.constant 0 : index
    %25 = vector.load %arg2[%c0_23, %c9, %c0_24] : memref<1x12x256xf32, #tpu.memory_space<vmem>>, vector<1x1x256xf32>
    %26 = vector.shape_cast %25 : vector<1x1x256xf32> to vector<1x256xf32>
    %c0_25 = arith.constant 0 : index
    %c5_26 = arith.constant 5 : index
    %c0_27 = arith.constant 0 : index
    %27 = vector.load %arg3[%c0_25, %c5_26, %c0_27] : memref<1x12x256xf32, #tpu.memory_space<vmem>>, vector<1x1x256xf32>
    %28 = vector.shape_cast %27 : vector<1x1x256xf32> to vector<1x256xf32>
    %29 = vector.shape_cast %26 : vector<1x256xf32> to vector<1x1x256xf32>
    tpu.vector_store %arg3[%c0_25, %c5_26, %c0_27], %29 {strides = array<i32>} : memref<1x12x256xf32, #tpu.memory_space<vmem>>, vector<1x1x256xf32>,
    %c0_28 = arith.constant 0 : index
    %c2_29 = arith.constant 2 : index
    %c0_30 = arith.constant 0 : index
    %30 = vector.load %arg2[%c0_28, %c2_29, %c0_30] : memref<1x12x256xf32, #tpu.memory_space<vmem>>, vector<1x1x256xf32>
    %31 = vector.shape_cast %30 : vector<1x1x256xf32> to vector<1x256xf32>
    %c0_31 = arith.constant 0 : index
    %c6 = arith.constant 6 : index
    %c0_32 = arith.constant 0 : index
    %32 = vector.load %arg3[%c0_31, %c6, %c0_32] : memref<1x12x256xf32, #tpu.memory_space<vmem>>, vector<1x1x256xf32>
    %33 = vector.shape_cast %32 : vector<1x1x256xf32> to vector<1x256xf32>
    %34 = vector.shape_cast %31 : vector<1x256xf32> to vector<1x1x256xf32>
    tpu.vector_store %arg3[%c0_31, %c6, %c0_32], %34 {strides = array<i32>} : memref<1x12x256xf32, #tpu.memory_space<vmem>>, vector<1x1x256xf32>,
    %c0_33 = arith.constant 0 : index
    %c6_34 = arith.constant 6 : index
    %c0_35 = arith.constant 0 : index
    %35 = vector.load %arg2[%c0_33, %c6_34, %c0_35] : memref<1x12x256xf32, #tpu.memory_space<vmem>>, vector<1x1x256xf32>
    %36 = vector.shape_cast %35 : vector<1x1x256xf32> to vector<1x256xf32>
    %c0_36 = arith.constant 0 : index
    %c7 = arith.constant 7 : index
    %c0_37 = arith.constant 0 : index
    %37 = vector.load %arg3[%c0_36, %c7, %c0_37] : memref<1x12x256xf32, #tpu.memory_space<vmem>>, vector<1x1x256xf32>
    %38 = vector.shape_cast %37 : vector<1x1x256xf32> to vector<1x256xf32>
    %39 = vector.shape_cast %36 : vector<1x256xf32> to vector<1x1x256xf32>
    tpu.vector_store %arg3[%c0_36, %c7, %c0_37], %39 {strides = array<i32>} : memref<1x12x256xf32, #tpu.memory_space<vmem>>, vector<1x1x256xf32>,
    %c0_38 = arith.constant 0 : index
    %c10 = arith.constant 10 : index
    %c0_39 = arith.constant 0 : index
    %40 = vector.load %arg2[%c0_38, %c10, %c0_39] : memref<1x12x256xf32, #tpu.memory_space<vmem>>, vector<1x1x256xf32>
    %41 = vector.shape_cast %40 : vector<1x1x256xf32> to vector<1x256xf32>
    %c0_40 = arith.constant 0 : index
    %c8_41 = arith.constant 8 : index
    %c0_42 = arith.constant 0 : index
    %42 = vector.load %arg3[%c0_40, %c8_41, %c0_42] : memref<1x12x256xf32, #tpu.memory_space<vmem>>, vector<1x1x256xf32>
    %43 = vector.shape_cast %42 : vector<1x1x256xf32> to vector<1x256xf32>
    %44 = vector.shape_cast %41 : vector<1x256xf32> to vector<1x1x256xf32>
    tpu.vector_store %arg3[%c0_40, %c8_41, %c0_42], %44 {strides = array<i32>} : memref<1x12x256xf32, #tpu.memory_space<vmem>>, vector<1x1x256xf32>,
    %c0_43 = arith.constant 0 : index
    %c3_44 = arith.constant 3 : index
    %c0_45 = arith.constant 0 : index
    %45 = vector.load %arg2[%c0_43, %c3_44, %c0_45] : memref<1x12x256xf32, #tpu.memory_space<vmem>>, vector<1x1x256xf32>
    %46 = vector.shape_cast %45 : vector<1x1x256xf32> to vector<1x256xf32>
    %c0_46 = arith.constant 0 : index
    %c9_47 = arith.constant 9 : index
    %c0_48 = arith.constant 0 : index
    %47 = vector.load %arg3[%c0_46, %c9_47, %c0_48] : memref<1x12x256xf32, #tpu.memory_space<vmem>>, vector<1x1x256xf32>
    %48 = vector.shape_cast %47 : vector<1x1x256xf32> to vector<1x256xf32>
    %49 = vector.shape_cast %46 : vector<1x256xf32> to vector<1x1x256xf32>
    tpu.vector_store %arg3[%c0_46, %c9_47, %c0_48], %49 {strides = array<i32>} : memref<1x12x256xf32, #tpu.memory_space<vmem>>, vector<1x1x256xf32>,
    %c0_49 = arith.constant 0 : index
    %c7_50 = arith.constant 7 : index
    %c0_51 = arith.constant 0 : index
    %50 = vector.load %arg2[%c0_49, %c7_50, %c0_51] : memref<1x12x256xf32, #tpu.memory_space<vmem>>, vector<1x1x256xf32>
    %51 = vector.shape_cast %50 : vector<1x1x256xf32> to vector<1x256xf32>
    %c0_52 = arith.constant 0 : index
    %c10_53 = arith.constant 10 : index
    %c0_54 = arith.constant 0 : index
    %52 = vector.load %arg3[%c0_52, %c10_53, %c0_54] : memref<1x12x256xf32, #tpu.memory_space<vmem>>, vector<1x1x256xf32>
    %53 = vector.shape_cast %52 : vector<1x1x256xf32> to vector<1x256xf32>
    %54 = vector.shape_cast %51 : vector<1x256xf32> to vector<1x1x256xf32>
    tpu.vector_store %arg3[%c0_52, %c10_53, %c0_54], %54 {strides = array<i32>} : memref<1x12x256xf32, #tpu.memory_space<vmem>>, vector<1x1x256xf32>,
    %c0_55 = arith.constant 0 : index
    %c11 = arith.constant 11 : index
    %c0_56 = arith.constant 0 : index
    %55 = vector.load %arg2[%c0_55, %c11, %c0_56] : memref<1x12x256xf32, #tpu.memory_space<vmem>>, vector<1x1x256xf32>
    %56 = vector.shape_cast %55 : vector<1x1x256xf32> to vector<1x256xf32>
    %c0_57 = arith.constant 0 : index
    %c11_58 = arith.constant 11 : index
    %c0_59 = arith.constant 0 : index
    %57 = vector.load %arg3[%c0_57, %c11_58, %c0_59] : memref<1x12x256xf32, #tpu.memory_space<vmem>>, vector<1x1x256xf32>
    %58 = vector.shape_cast %57 : vector<1x1x256xf32> to vector<1x256xf32>
    %59 = vector.shape_cast %56 : vector<1x256xf32> to vector<1x1x256xf32>
    tpu.vector_store %arg3[%c0_57, %c11_58, %c0_59], %59 {strides = array<i32>} : memref<1x12x256xf32, #tpu.memory_space<vmem>>, vector<1x1x256xf32>,
    return
  }
  func.func @transform_0(%arg0: i32, %arg1: i32) -> (i32, i32, i32) {
    %c0_i32 = arith.constant 0 : i32
    %c0_i32_0 = arith.constant 0 : i32
    return %arg0, %c0_i32, %arg1 : i32, i32, i32
  }
  func.func @transform_1(%arg0: i32, %arg1: i32) -> (i32, i32, i32) {
    %c0_i32 = arith.constant 0 : i32
    %c0_i32_0 = arith.constant 0 : i32
    return %arg0, %c0_i32, %arg1 : i32, i32, i32
  }
}

</mosaic_0001>

<bundles_post_ra>
// kernel: channel_shuffle.1
= control target key start
LH: loop header
LB: loop body
LE: loop exit
PB: predicated region body
PF: predicated region fallthrough
CT: control target
= control target key end

     0   :  { %s398_s6 = smov 0   ;;  %s400_s7 = smov 0   ;;  %s459_s0 = inlined_call_operand.vmem [shape: f32[2,12,256], index: 0, kind: input, shape index: {}]   ;;  %s460_s1 = inlined_call_operand.vmem [shape: f32[2,12,256], index: 1, kind: output, shape index: {}]  }
   0x1   :  { %s402_s8 = smov 0  }
   0x2 LB: > { %s23_s9 = sadd.s32 1, %s382_s7  ;;  %p309_p0 = scmp.ge.s32.totalorder %s386_s8, 1  ;;  %s386_s8 = sphi %s402_s8, %s11_s8   ;;  %s382_s7 = sphi %s400_s7, %s464_s7   ;;  %s378_s6 = sphi %s398_s6, %s463_s6  }
   0x3   : > { %p25_p1 = scmp.ge.s32.totalorder %s23_s9, 2  ;;  %p108_p2 = scmp.lt.s32.totalorder %s386_s8, 3 }
   0x5   : > { %s466_s9 = smov (%p25_p1, %s23_s9), 0  ;;  %p109_p3 = pnand %p309_p0, %p108_p2 }
   0x6   : > { %p137_p4 = scmp.lt.s32.totalorder (!%p109_p3), %s378_s6, 1 }
   0x7   : > { %112 = sbr.rel (%p109_p3) target bundleno = 28 (0x1c), region = 24 }
   0xc   : > { %v157_v0 = vlaneseq  ;;  %s468_s6 = smov (!%p137_p4, %s378_s6), 1 }
   0xd   : > { %s338_s10 = sshll.u32 %s468_s6, 5 }
   0xe   : > { %vm416_vm0 = vcmp.lt.s32.totalorder %v157_v0, 256  ;;  %s144_s13 = scalar_lea.vmem %s459_s0, %s338_s10  ;;  %s154_s16 = scalar_lea.vmem %s460_s1, %s338_s10 }
   0xf   : > { %v156_v2 = vld [vmem:[%s144_s13] ss:$8 sm:$0x3]  ;;  %v314_v3 = vld [vmem:[%s144_s13 + $0x4] ss:$8 sm:$0x3] }
  0x10   : > { %161 = vst.msk [vmem:[%s154_s16] ss:$8 sm:$0x3] %vm416_vm0, %v156_v2  ;;  %v316_v4 = vld [vmem:[%s144_s13 + $0x10] ss:$8 sm:$0x3] }
  0x11   : > { %315 = vst.msk [vmem:[%s154_s16 + $0x1] ss:$8 sm:$0x3] %vm416_vm0, %v314_v3  ;;  %v318_v5 = vld [vmem:[%s144_s13 + $0x1] ss:$8 sm:$0x3] }
  0x12   : > { %317 = vst.msk [vmem:[%s154_s16 + $0x2] ss:$8 sm:$0x3] %vm416_vm0, %v316_v4  ;;  %v320_v6 = vld [vmem:[%s144_s13 + $0x5] ss:$8 sm:$0x3] }
  0x13   : > { %319 = vst.msk [vmem:[%s154_s16 + $0x3] ss:$8 sm:$0x3] %vm416_vm0, %v318_v5  ;;  %v322_v7 = vld [vmem:[%s144_s13 + $0x11] ss:$8 sm:$0x3] }
  0x14   : > { %321 = vst.msk [vmem:[%s154_s16 + $0x4] ss:$8 sm:$0x3] %vm416_vm0, %v320_v6  ;;  %v324_v8 = vld [vmem:[%s144_s13 + $0x2] ss:$8 sm:$0x3] }
  0x15   : > { %323 = vst.msk [vmem:[%s154_s16 + $0x5] ss:$8 sm:$0x3] %vm416_vm0, %v322_v7  ;;  %v326_v9 = vld [vmem:[%s144_s13 + $0x6] ss:$8 sm:$0x3] }
  0x16   : > { %325 = vst.msk [vmem:[%s154_s16 + $0x6] ss:$8 sm:$0x3] %vm416_vm0, %v324_v8  ;;  %v328_v10 = vld [vmem:[%s144_s13 + $0x12] ss:$8 sm:$0x3] }
  0x17   : > { %327 = vst.msk [vmem:[%s154_s16 + $0x7] ss:$8 sm:$0x3] %vm416_vm0, %v326_v9  ;;  %v330_v11 = vld [vmem:[%s144_s13 + $0x3] ss:$8 sm:$0x3] }
  0x18   : > { %329 = vst.msk [vmem:[%s154_s16 + $0x10] ss:$8 sm:$0x3] %vm416_vm0, %v328_v10  ;;  %v332_v12 = vld [vmem:[%s144_s13 + $0x7] ss:$8 sm:$0x3] }
  0x19   : > { %331 = vst.msk [vmem:[%s154_s16 + $0x11] ss:$8 sm:$0x3] %vm416_vm0, %v330_v11  ;;  %v334_v13 = vld [vmem:[%s144_s13 + $0x13] ss:$8 sm:$0x3] }
  0x1a   : > { %333 = vst.msk [vmem:[%s154_s16 + $0x12] ss:$8 sm:$0x3] %vm416_vm0, %v332_v12 }
  0x1b   : > { %335 = vst.msk [vmem:[%s154_s16 + $0x13] ss:$8 sm:$0x3] %vm416_vm0, %v334_v13 }
  0x1c PF: > { %s11_s8 = sadd.s32 1, %s386_s8   ;;  %s463_s6 = smov %s382_s7 }
  0x1d   : > { %p8_p5 = scmp.ge.s32.totalorder %s11_s8, 4   ;;  %s464_s7 = smov %s466_s9 }
  0x1f   :  { %10 = sbr.rel (!%p8_p5) target bundleno = 2 (0x2), region = 76 }

</bundles_post_ra>
